<compile_context>
chip_gen: v7x
topology: tpu7x:2x2x1
jax: 0.10.0
libtpu: 0.0.40
codegen_flags: <defaults>
</compile_context>

<pallas_src>
import math

import jax
import jax.numpy as jnp
from jax.experimental import pallas as pl
from jax.experimental.pallas import tpu as pltpu


def _round_up(x, m):
    return ((x + m - 1) // m) * m


def _proj_kernel(x_ref, w_ref, b_ref, o_ref):
    # x_ref: (tm, d_model)  compute dtype
    # w_ref: (d_model, tn)  compute dtype (or narrower storage dtype, e.g. fp8)
    # b_ref: (1, tn)        f32
    # o_ref: (tm, tn)       out dtype
    w = w_ref[...]
    if w.dtype != x_ref.dtype:
        w = w.astype(x_ref.dtype)  # e.g. fp8-stored weights dequantized per tile
    acc = jnp.dot(x_ref[...], w, preferred_element_type=jnp.float32)
    o_ref[...] = (acc + b_ref[...]).astype(o_ref.dtype)


def _scoped_vmem_limit():
    try:
        cap = pltpu.get_tpu_info().vmem_capacity_bytes
    except Exception:
        cap = 64 << 20  # conservative (v7x-sized) fallback
    # 96 MiB on 128-MiB v5e/v6e, 48 MiB on 64-MiB v7x; always above the
    # 16-32 MiB scoped default so double buffering of the weight tile survives.
    return min(int(cap * 3 // 4), 100 << 20)


def _select_tiles(M, d_model, vocab, comp_bytes, out_bytes, vmem_budget,
                  tm_max=512, tn_max=2048):
    """Largest (tm, tn) whose double-buffered footprint fits the VMEM budget."""
    tm_cap = min(_round_up(M, 16), tm_max)          # 16-row aligned (bf16 packing)
    tn_cap = min(_round_up(vocab, 128), tn_max)     # lane-dense vocab tiles

    def footprint(tm, tn):
        # double-buffered x, W, bias and output tiles
        return 2 * (tm * d_model * comp_bytes
                    + d_model * tn * comp_bytes
                    + tn * 4
                    + tm * tn * out_bytes)

    tm = tm_cap
    while True:
        tn = tn_cap
        while tn > 128 and footprint(tm, tn) > vmem_budget:
            tn -= 128
        if footprint(tm, tn) <= vmem_budget or tm <= 16:
            return tm, tn
        tm = max(16, _round_up(tm // 2, 16))


def prepare_projection_params(weight_pt, bias, compute_dtype=jnp.bfloat16):
    """One-time init: transpose PyTorch (vocab, d_model) weight to (d_model, vocab)
    and cast to the compute dtype so the per-call path does NO weight cast/pad."""
    w = jnp.asarray(weight_pt).T.astype(compute_dtype)      # (d_model, vocab)
    b = jnp.asarray(bias).astype(jnp.float32)               # (vocab,)
    return w, b


def projection_layer(x, weight, bias, *, out_dtype=None, tm=None, tn=None):
    """y = x @ weight + bias  (PyTorch nn.Linear forward).

    x:      (batch, seq, d_model)  -- cast per call to the compute dtype (small).
    weight: (d_model, vocab)       -- must arrive pre-cast (use prepare_projection_params).
    bias:   (vocab,) or (1, vocab) -- f32 recommended.
    Returns (batch, seq, vocab) in `out_dtype` (default: the compute dtype).
    """
    batch, seq, d_model = x.shape
    assert weight.shape[0] == d_model
    vocab = weight.shape[1]
    M = batch * seq

    # Compute dtype follows the stored weight dtype (bf16 recommended).
    if weight.dtype in (jnp.dtype(jnp.bfloat16), jnp.dtype(jnp.float32)):
        compute_dtype = weight.dtype
    else:
        compute_dtype = jnp.dtype(jnp.bfloat16)  # narrow (e.g. fp8) weight storage
    if out_dtype is None:
        out_dtype = compute_dtype
    out_dtype = jnp.dtype(out_dtype)

    x2d = x.reshape(M, d_model)
    if x2d.dtype != compute_dtype:
        x2d = x2d.astype(compute_dtype)
    b2d = bias.reshape(1, vocab)
    if b2d.dtype != jnp.float32:
        b2d = b2d.astype(jnp.float32)

    vmem_limit = _scoped_vmem_limit()
    comp_bytes = jnp.dtype(compute_dtype).itemsize
    out_bytes = out_dtype.itemsize
    if tm is None or tn is None:
        tm_sel, tn_sel = _select_tiles(M, d_model, vocab, comp_bytes, out_bytes,
                                       int(vmem_limit * 0.7))
        tm = tm_sel if tm is None else tm
        tn = tn_sel if tn is None else tn
    tm = min(_round_up(tm, 16), _round_up(M, 16))
    tn = min(_round_up(tn, 128), _round_up(vocab, 128))

    n_tiles = pl.cdiv(vocab, tn)
    m_tiles = pl.cdiv(M, tm)

    flops = 2 * M * d_model * vocab
    bytes_accessed = (x2d.size * x2d.dtype.itemsize
                      + weight.size * weight.dtype.itemsize
                      + b2d.size * b2d.dtype.itemsize
                      + M * vocab * out_bytes)

    out2d = pl.pallas_call(
        _proj_kernel,
        out_shape=jax.ShapeDtypeStruct((M, vocab), out_dtype),
        grid_spec=pltpu.PrefetchScalarGridSpec(
            num_scalar_prefetch=0,
            # vocab tiles outer, M tiles inner: the weight block index is
            # constant across the inner axis, so each weight tile is read from
            # HBM exactly once (weight streaming near the HBM roofline).
            grid=(n_tiles, m_tiles),
            in_specs=[
                pl.BlockSpec((tm, d_model), lambda j, i: (i, 0)),   # x tile
                pl.BlockSpec((d_model, tn), lambda j, i: (0, j)),   # W tile
                pl.BlockSpec((1, tn), lambda j, i: (0, j)),         # bias tile
            ],
            out_specs=pl.BlockSpec((tm, tn), lambda j, i: (i, j)),
        ),
        compiler_params=pltpu.CompilerParams(
            # vocab axis parallel / M axis arbitrary: v7x megacore shards the
            # vocab dimension so the weight stream stays 1x chip-wide.
            dimension_semantics=("parallel", "arbitrary"),
            vmem_limit_bytes=vmem_limit,
        ),
        cost_estimate=pl.CostEstimate(
            flops=flops, transcendentals=0, bytes_accessed=bytes_accessed),
    )(x2d, weight, b2d)

    return out2d.reshape(batch, seq, vocab)


if __name__ == "__main__":
    # Small shapes consistent with the module: (batch, seq, d_model) -> (batch, seq, vocab)
    batch, seq, d_model, vocab = 2, 8, 32, 64

    key = jax.random.PRNGKey(0)
    kx, kw, kb = jax.random.split(key, 3)

    # Deterministic PyTorch-style init: U(-1/sqrt(d_model), 1/sqrt(d_model))
    bound = 1.0 / math.sqrt(d_model)
    w_pt = jax.random.uniform(kw, (vocab, d_model), jnp.float32, -bound, bound)
    bias = jax.random.uniform(kb, (vocab,), jnp.float32, -bound, bound)
    x = jax.random.normal(kx, (batch, seq, d_model), jnp.float32)

    # Reference in plain JAX (same math as torch's nn.Linear forward).
    ref = x @ w_pt.T + bias

    # Strict-correctness path: f32 weights / f32 compute / f32 output.
    w_f32, b_f32 = prepare_projection_params(w_pt, bias, compute_dtype=jnp.float32)
    out_f32 = jax.block_until_ready(
        projection_layer(x, w_f32, b_f32, out_dtype=jnp.float32))
    assert out_f32.shape == (batch, seq, vocab)
    assert jnp.allclose(out_f32, ref, atol=1e-5, rtol=1e-5), "f32 mismatch vs reference"

    # Default (perf) path: bf16 weights prepared once at init, bf16 MXU inputs,
    # f32 accumulation, bf16 logits out.
    w_bf16, b_f32 = prepare_projection_params(w_pt, bias, compute_dtype=jnp.bfloat16)
    out_bf16 = jax.block_until_ready(projection_layer(x, w_bf16, b_f32))
    assert out_bf16.shape == (batch, seq, vocab)
    assert out_bf16.dtype == jnp.bfloat16
    assert jnp.allclose(out_bf16.astype(jnp.float32), ref, atol=3e-2, rtol=3e-2), \
        "bf16 mismatch vs reference"

    print("KERNEL_OK")
</pallas_src>

<mosaic_0001>
module attributes {stable_mosaic.version = 11 : i64} {
  func.func @_proj_kernel(%arg0: i32, %arg1: i32, %arg2: memref<16x32xf32, #tpu.memory_space<vmem>>, %arg3: memref<32x128xf32, #tpu.memory_space<vmem>>, %arg4: memref<1x128xf32, #tpu.memory_space<vmem>>, %arg5: memref<16x128xf32, #tpu.memory_space<vmem>>) attributes {dimension_semantics = [#tpu.dimension_semantics<parallel>, #tpu.dimension_semantics<arbitrary>], iteration_bounds = array<i64: 1, 1>, scalar_prefetch = 0 : i64, scratch_operands = 0 : i64, tpu.core_type = #tpu.core_type<tc>, window_params = [{transform_indices = @transform_0, window_bounds = array<i64: 16, 32>}, {transform_indices = @transform_1, window_bounds = array<i64: 32, 128>}, {transform_indices = @transform_2, window_bounds = array<i64: 1, 128>}, {transform_indices = @transform_3, window_bounds = array<i64: 16, 128>}]} {
    %c0 = arith.constant 0 : index
    %c0_0 = arith.constant 0 : index
    %0 = vector.load %arg3[%c0, %c0_0] : memref<32x128xf32, #tpu.memory_space<vmem>>, vector<32x128xf32>
    %c0_1 = arith.constant 0 : index
    %c0_2 = arith.constant 0 : index
    %1 = vector.load %arg2[%c0_1, %c0_2] : memref<16x32xf32, #tpu.memory_space<vmem>>, vector<16x32xf32>
    %cst = arith.constant dense<0.000000e+00> : vector<16x128xf32>
    %2 = tpu.matmul %1, %0, %cst {dimension_numbers = #tpu.dot_dimension_numbers<[1], [0], [0], [1], [0, 0, 1, 1], [], []>} : vector<16x32xf32>, vector<32x128xf32>, vector<16x128xf32> -> vector<16x128xf32>
    %c0_3 = arith.constant 0 : index
    %c0_4 = arith.constant 0 : index
    %3 = vector.load %arg4[%c0_3, %c0_4] : memref<1x128xf32, #tpu.memory_space<vmem>>, vector<1x128xf32>
    %4 = vector.broadcast %3 : vector<1x128xf32> to vector<16x128xf32>
    %5 = arith.addf %2, %4 : vector<16x128xf32>
    %c0_5 = arith.constant 0 : index
    %c0_6 = arith.constant 0 : index
    %6 = vector.load %arg5[%c0_5, %c0_6] : memref<16x128xf32, #tpu.memory_space<vmem>>, vector<16x128xf32>
    tpu.vector_store %arg5[%c0_5, %c0_6], %5 {strides = array<i32>} : memref<16x128xf32, #tpu.memory_space<vmem>>, vector<16x128xf32>,
    return
  }
  func.func @transform_0(%arg0: i32, %arg1: i32) -> (i32, i32) {
    %c0_i32 = arith.constant 0 : i32
    %c0_i32_0 = arith.constant 0 : i32
    return %arg1, %c0_i32 : i32, i32
  }
  func.func @transform_1(%arg0: i32, %arg1: i32) -> (i32, i32) {
    %c0_i32 = arith.constant 0 : i32
    %c0_i32_0 = arith.constant 0 : i32
    return %c0_i32, %arg0 : i32, i32
  }
  func.func @transform_2(%arg0: i32, %arg1: i32) -> (i32, i32) {
    %c0_i32 = arith.constant 0 : i32
    %c0_i32_0 = arith.constant 0 : i32
    return %c0_i32, %arg0 : i32, i32
  }
  func.func @transform_3(%arg0: i32, %arg1: i32) -> (i32, i32) {
    %c0_i32 = arith.constant 0 : i32
    return %arg1, %arg0 : i32, i32
  }
}

</mosaic_0001>

<bundles_post_ra>
// kernel: tpu_custom_call.1
= control target key start
LH: loop header
LB: loop body
LE: loop exit
PB: predicated region body
PF: predicated region fallthrough
CT: control target
= control target key end

     0   :  { %8 = vsyncpa [#allocation3], 0  ;;  %s336_s0 = inlined_call_operand.hbm [shape: f32[16,32], index: 0, kind: input, shape index: {}]   ;;  %s337_s1 = inlined_call_operand.hbm [shape: f32[32,64], index: 1, kind: input, shape index: {}]   ;;  %s338_s2 = inlined_call_operand.vmem [shape: f32[1,64], index: 2, kind: input, shape index: {}]   ;;  %s339_s3 = inlined_call_operand.hbm [shape: f32[16,64], index: 3, kind: output, shape index: {}]  }
   0x1   :  { %9 = vsyncpa [#allocation6], 0 }
   0x2   :  { %10 = vsyncpa [#allocation4], 0  ;;  %s263_s12 = smov [#allocation2]   ;;  %s191_s16 = scalar_lea.hbm %s336_s0, 256 }
   0x3   :  { %s16_s13 = sshll.u32 %s263_s12, 4  ;;  %p192_p0 = scmp.ne.s32.totalorder %s336_s0, %s191_s16  ;;  %s17_s13 = int_to_ptr.vmem [resolvable:$true] %s16_s13 }
   0x4   :  { %p195_p1 = scmp.lt.u32.totalorder %s191_s16, %s336_s0 }
   0x6   :  { %p197_p2 = pnand %p195_p1, %p192_p0 }
   0x8   :  { %200 = shalt.err (!%p197_p2)
}
   0x9   :  { %s201_s21 = scalar_lea.vmem %s17_s13, 256  ;;  %p206_p4 = scmp.lt.s32.totalorder %s17_s13, %s17_s13 }
   0xa   :  { %p202_p3 = scmp.ne.s32.totalorder %s17_s13, %s201_s21  ;;  %p207_p5 = scmp.lt.s32.totalorder %s201_s21, %s201_s21 }
   0xc   :  { %p208_p6 = por %p207_p5, %p206_p4 }
   0xe   :  { %p209_p7 = pnand %p208_p6, %p202_p3 }
  0x10   :  { %212 = shalt.err (!%p209_p7)
}
  0x11   :  { %s264_s22 = smov 128   ;;  %s265_s23 = smov 8  }
  0x12   :  { %22 = dma.hbm_to_vmem [thread:$0]  %s336_s0, 256, %s17_s13, [#allocation3], %s264_s22, %s264_s22, %s265_s23  }
  0x13   :  { %s266_s26 = smov [#allocation5]   ;;  %s213_s30 = scalar_lea.hbm %s337_s1, 512 }
  0x14   :  { %s28_s27 = sshll.u32 %s266_s26, 4  ;;  %p214_p8 = scmp.ne.s32.totalorder %s337_s1, %s213_s30  ;;  %s29_s27 = int_to_ptr.vmem [resolvable:$true] %s28_s27 }
  0x15   :  { %p217_p9 = scmp.lt.u32.totalorder %s213_s30, %s337_s1 }
  0x17   :  { %p219_p10 = pnand %p217_p9, %p214_p8 }
  0x19   :  { %222 = shalt.err (!%p219_p10)
}
  0x1a   :  { %s223_s8 = scalar_lea.vmem %s29_s27, 512  ;;  %p228_p12 = scmp.lt.s32.totalorder %s29_s27, %s29_s27 }
  0x1b   :  { %p224_p11 = scmp.ne.s32.totalorder %s29_s27, %s223_s8  ;;  %p229_p13 = scmp.lt.s32.totalorder %s223_s8, %s223_s8 }
  0x1d   :  { %p230_p0 = por %p229_p13, %p228_p12 }
  0x1f   :  { %p231_p1 = pnand %p230_p0, %p224_p11 }
  0x21   :  { %234 = shalt.err (!%p231_p1)
}
  0x22   :  { %34 = dma.hbm_to_vmem [thread:$0]  %s337_s1, 512, %s29_s27, [#allocation6], %s264_s22, %s264_s22, %s265_s23  }
  0x23   :  { %257 = dma.done.wait [#allocation3], 256  }
  0x24   :  { %258 = vsyncadd [#allocation3], 4294967040 }
  0x25   :  { %259 = dma.done.wait [#allocation6], 512  }
  0x26   :  { %260 = vsyncadd [#allocation6], 4294966784  ;;  %vm56_vm0 = vcmask 261120   ;;  %v43_v0 = vld [vmem:[#allocation5] sm:$0xff]  ;;  %v44_v1 = vld [vmem:[#allocation5 + $0x8] sm:$0xff]  ;;  %s267_s11 = smov [#allocation7]  }
  0x27   :  { %v45_v2 = vld [vmem:[#allocation5 + $0x10] sm:$0xff]  ;;  %v178_v3 = vpack.c.bf16 %v44_v1, %v43_v0  ;;  %v46_v4 = vld [vmem:[#allocation5 + $0x18] sm:$0xff]  ;;  %s145_s12 = sshll.u32 %s267_s11, 4  ;;  %s146_s12 = int_to_ptr.vmem [resolvable:$true] %s145_s12 }
  0x28   :  { %v47_v5 = vld [vmem:[#allocation2] sm:$0xff]  ;;  %v182_v6 = vpack.c.bf16 %v46_v4, %v45_v2  ;;  %v48_v7 = vld [vmem:[#allocation2 + $0x8] sm:$0xff]  ;;  %s235_s13 = scalar_lea.vmem %s146_s12, 256  ;;  %p240_p3 = scmp.lt.s32.totalorder %s146_s12, %s146_s12 }
  0x29   :  { %175 = vmatprep.mubr.msk.f32.mxu0 %vm56_vm0, %v47_v5  ;;  %179 = vmatprep.subr.bf16.mxu0 %v178_v3  ;;  %v158_v8 = vld [vmem:[%s338_s2] ss:$0 sm:$0xff]  ;;  %p236_p2 = scmp.ne.s32.totalorder %s146_s12, %s235_s13  ;;  %p241_p4 = scmp.lt.s32.totalorder %s235_s13, %s235_s13 }
  0x2a   :  { %181 = vmatpush3.bf16.msra.mxu0 %v178_v3 }
  0x2b   :  { %183 = vmatprep.subr.bf16.mxu0 %v182_v6  ;;  %p242_p5 = por %p241_p4, %p240_p3 }
  0x2d   :  { %p243_p6 = pnand %p242_p5, %p236_p2 }
  0x2e   :  { %185 = vmatpush3.bf16.msra.mxu0 %v182_v6 }
  0x31   :  { %176 = vmatmul.mubr.msk.f32.vlgmr.msra.gmra.mrb[0].mxu0 %vm56_vm0, %v48_v7 }
 0x104   :  { %v177_v9 = vpop.f32.mrb[0].mxu0 }
 0x105   :  { %v135_v10 = vadd.f32 %v177_v9, %v158_v8  ;;  %v129_v11 = vpop.f32.mrb[1].mxu0 }
 0x106   :  { %v130_v12 = vadd.f32 %v158_v8, %v129_v11 }
 0x107   :  { %139 = vst [vmem:[#allocation7 + $0x8] sm:$0xff] %v135_v10 }
 0x108   :  { %138 = vst [vmem:[#allocation7] sm:$0xff] %v130_v12 }
 0x109   :  { %246 = shalt.err (!%p243_p6)
}
 0x10a   :  { %s247_s2 = scalar_lea.hbm %s339_s3, 256 }
 0x10b   :  { %p248_p7 = scmp.ne.s32.totalorder %s339_s3, %s247_s2  ;;  %p251_p8 = scmp.lt.u32.totalorder %s247_s2, %s339_s3 }
 0x10d   :  { %p253_p9 = pnand %p251_p8, %p248_p7 }
 0x10f   :  { %256 = shalt.err (!%p253_p9)
}
 0x110   :  { %151 = dma.vmem_to_hbm [thread:$0]  %s146_s12, 256, %s339_s3, [#allocation4], %s264_s22, %s264_s22, %s265_s23  }
 0x111   :  { %261 = dma.done.wait [#allocation4], 256  }
 0x112   :  { %262 = vsyncadd [#allocation4], 4294967040 }
 0x113   :  { %155 = vsyncpa [#allocation3], 1 }
 0x114   :  { %156 = vsyncpa [#allocation6], 1 }
 0x115   :  { %157 = vsyncpa [#allocation4], 1 }

</bundles_post_ra>
